<compile_context>
chip_gen: v6e
topology: v6e:2x2x1
jax: 0.10.0
libtpu: 0.0.40
codegen_flags: <defaults>
</compile_context>

<pallas_src>
import jax
import jax.numpy as jnp
from jax.experimental import pallas as pl
from jax.experimental.pallas import tpu as pltpu


def policy_mlp_kernel(x_ref, w1_ref, b1_ref, w2_ref, b2_ref, w3_ref, b3_ref, out_ref):
    """One (TB, input_dim) batch tile -> one fused (TB, 2*action_dim) output tile."""
    cd = w1_ref.dtype  # matmul operand dtype (f32, or bf16 on v6e/v7x)
    # Layer 1: Linear + ReLU (MXU matmul, f32 accumulation; elementwise in f32)
    h = jnp.dot(x_ref[...].astype(cd), w1_ref[...], preferred_element_type=jnp.float32)
    h = jnp.maximum(h + b1_ref[...], 0.0)
    # Layer 2: Linear + ReLU
    h = jnp.dot(h.astype(cd), w2_ref[...], preferred_element_type=jnp.float32)
    h = jnp.maximum(h + b2_ref[...], 0.0)
    # Output head: Linear (Identity) -> single fused [mean | log_std] slab, one store
    out = jnp.dot(h.astype(cd), w3_ref[...], preferred_element_type=jnp.float32) + b3_ref[...]
    out_ref[...] = out.astype(out_ref.dtype)


def policy_network_forward(state, params, action_dim, *,
                           compute_dtype=jnp.float32, block_batch=512):
    """state: (B, input_dim) f32.  Returns (action_mean, action_log_std), each (B, action_dim)."""
    w1, b1, w2, b2, w3, b3 = params
    B, input_dim = state.shape
    out_dim = w3.shape[1]
    assert out_dim == 2 * action_dim

    # bf16 MXU operands on v6e/v7x (f32 accumulation inside the kernel); biases stay
    # f32 so bias-add / ReLU run on the f32 VPU path (matters on v5e).
    if compute_dtype != jnp.float32:
        w1 = w1.astype(compute_dtype)
        w2 = w2.astype(compute_dtype)
        w3 = w3.astype(compute_dtype)

    # Batch tiling: large tiles amortize per-step overhead; at tiny B take the whole
    # batch in one block (block shape == full array dims is always legal).
    if B <= block_batch:
        tb, padded_b = B, B
        x = state
    else:
        tb = block_batch
        padded_b = pl.cdiv(B, tb) * tb
        x = jnp.pad(state, ((0, padded_b - B), (0, 0))) if padded_b != B else state
    grid = (padded_b // tb,)

    def resident(arr):  # constant index_map -> DMA'd once, stays resident across the grid
        return pl.BlockSpec(arr.shape, lambda i: (0, 0))

    fused = pl.pallas_call(
        policy_mlp_kernel,
        out_shape=jax.ShapeDtypeStruct((padded_b, out_dim), jnp.float32),
        grid_spec=pl.GridSpec(
            grid=grid,
            in_specs=[
                pl.BlockSpec((tb, input_dim), lambda i: (i, 0)),   # batch-tiled state
                resident(w1), resident(b1),
                resident(w2), resident(b2),
                resident(w3), resident(b3),
            ],
            out_specs=pl.BlockSpec((tb, out_dim), lambda i: (i, 0)),
        ),
        compiler_params=pltpu.CompilerParams(
            dimension_semantics=("parallel",)),  # megacore sharding on v7x
    )(x, w1, b1, w2, b2, w3, b3)

    fused = fused[:B]
    # Split mean / log_std in the wrapper (free layout plumbing; keeps the kernel's
    # store a single lane-dense slab instead of two masked 4-lane writes).
    return fused[:, :action_dim], fused[:, action_dim:]


def init_params(key, input_dim, hidden_dims, action_dim):
    """Deterministic Linear params.  Weights stored as (in, out) = PyTorch weight.T."""
    dims = [input_dim] + list(hidden_dims) + [action_dim * 2]
    params = []
    for i in range(len(dims) - 1):
        key, kw, kb = jax.random.split(key, 3)
        fan_in, fan_out = dims[i], dims[i + 1]
        bound = 1.0 / jnp.sqrt(fan_in)  # matches torch.nn.Linear default init range
        w = jax.random.uniform(kw, (fan_in, fan_out), jnp.float32, -bound, bound)
        b = jax.random.uniform(kb, (1, fan_out), jnp.float32, -bound, bound)
        params.extend([w, b])
    return tuple(params)


def reference_forward(state, params, action_dim):
    w1, b1, w2, b2, w3, b3 = params
    h = jnp.maximum(state @ w1 + b1, 0.0)
    h = jnp.maximum(h @ w2 + b2, 0.0)
    out = h @ w3 + b3
    return out[:, :action_dim], out[:, action_dim:]


if __name__ == "__main__":
    # Small shapes consistent with the module: config.sample_size -> action_dim
    batch = 2
    input_dim = 16
    hidden_dims = [32, 32]
    action_dim = 4  # config.sample_size

    key = jax.random.PRNGKey(0)
    key, k_state = jax.random.split(key)
    state = jax.random.normal(k_state, (batch, input_dim), jnp.float32)
    params = init_params(key, input_dim, hidden_dims, action_dim)

    ref_mean, ref_log_std = reference_forward(state, params, action_dim)

    # f32 path: exact match with reference
    mean, log_std = policy_network_forward(state, params, action_dim)
    jax.block_until_ready((mean, log_std))
    assert mean.shape == (batch, action_dim) and log_std.shape == (batch, action_dim)
    assert jnp.allclose(mean, ref_mean, atol=1e-5), "mean mismatch (f32)"
    assert jnp.allclose(log_std, ref_log_std, atol=1e-5), "log_std mismatch (f32)"

    # bf16 MXU-operand path (v6e/v7x): f32 accumulation, relaxed tolerance
    mean_bf, log_std_bf = policy_network_forward(
        state, params, action_dim, compute_dtype=jnp.bfloat16)
    jax.block_until_ready((mean_bf, log_std_bf))
    assert jnp.allclose(mean_bf, ref_mean, atol=2e-2, rtol=2e-2), "mean mismatch (bf16)"
    assert jnp.allclose(log_std_bf, ref_log_std, atol=2e-2, rtol=2e-2), "log_std mismatch (bf16)"

    # Larger, non-divisible batch to exercise the tiled + padded grid path.
    big_b = 600
    key, k_big = jax.random.split(key)
    big_state = jax.random.normal(k_big, (big_b, input_dim), jnp.float32)
    mean_big, log_std_big = policy_network_forward(
        big_state, params, action_dim, block_batch=256)
    jax.block_until_ready((mean_big, log_std_big))
    ref_mean_big, ref_log_std_big = reference_forward(big_state, params, action_dim)
    assert jnp.allclose(mean_big, ref_mean_big, atol=1e-4), "mean mismatch (tiled)"
    assert jnp.allclose(log_std_big, ref_log_std_big, atol=1e-4), "log_std mismatch (tiled)"

    print("KERNEL_OK")
</pallas_src>

<mosaic_0001>
module attributes {stable_mosaic.version = 11 : i64} {
  func.func @policy_mlp_kernel(%arg0: i32, %arg1: memref<2x16xf32, #tpu.memory_space<vmem>>, %arg2: memref<16x32xf32, #tpu.memory_space<vmem>>, %arg3: memref<1x32xf32, #tpu.memory_space<vmem>>, %arg4: memref<32x32xf32, #tpu.memory_space<vmem>>, %arg5: memref<1x32xf32, #tpu.memory_space<vmem>>, %arg6: memref<32x8xf32, #tpu.memory_space<vmem>>, %arg7: memref<1x8xf32, #tpu.memory_space<vmem>>, %arg8: memref<2x8xf32, #tpu.memory_space<vmem>>) attributes {dimension_semantics = [#tpu.dimension_semantics<parallel>], iteration_bounds = array<i64: 1>, scalar_prefetch = 0 : i64, scratch_operands = 0 : i64, tpu.core_type = #tpu.core_type<tc>, window_params = [{transform_indices = @transform_0, window_bounds = array<i64: 2, 16>}, {pipeline_mode = #tpu.pipeline_mode<synchronous>, transform_indices = @transform_1, window_bounds = array<i64: 16, 32>}, {pipeline_mode = #tpu.pipeline_mode<synchronous>, transform_indices = @transform_2, window_bounds = array<i64: 1, 32>}, {pipeline_mode = #tpu.pipeline_mode<synchronous>, transform_indices = @transform_3, window_bounds = array<i64: 32, 32>}, {pipeline_mode = #tpu.pipeline_mode<synchronous>, transform_indices = @transform_4, window_bounds = array<i64: 1, 32>}, {pipeline_mode = #tpu.pipeline_mode<synchronous>, transform_indices = @transform_5, window_bounds = array<i64: 32, 8>}, {pipeline_mode = #tpu.pipeline_mode<synchronous>, transform_indices = @transform_6, window_bounds = array<i64: 1, 8>}, {transform_indices = @transform_7, window_bounds = array<i64: 2, 8>}]} {
    %c0 = arith.constant 0 : index
    %c0_0 = arith.constant 0 : index
    %0 = vector.load %arg1[%c0, %c0_0] : memref<2x16xf32, #tpu.memory_space<vmem>>, vector<2x16xf32>
    %c0_1 = arith.constant 0 : index
    %c0_2 = arith.constant 0 : index
    %1 = vector.load %arg2[%c0_1, %c0_2] : memref<16x32xf32, #tpu.memory_space<vmem>>, vector<16x32xf32>
    %cst = arith.constant dense<0.000000e+00> : vector<2x32xf32>
    %2 = tpu.matmul %0, %1, %cst {dimension_numbers = #tpu.dot_dimension_numbers<[1], [0], [0], [1], [0, 0, 1, 1], [], []>} : vector<2x16xf32>, vector<16x32xf32>, vector<2x32xf32> -> vector<2x32xf32>
    %c0_3 = arith.constant 0 : index
    %c0_4 = arith.constant 0 : index
    %3 = vector.load %arg3[%c0_3, %c0_4] : memref<1x32xf32, #tpu.memory_space<vmem>>, vector<1x32xf32>
    %4 = vector.broadcast %3 : vector<1x32xf32> to vector<2x32xf32>
    %5 = arith.addf %2, %4 : vector<2x32xf32>
    %cst_5 = arith.constant 0.000000e+00 : f32
    %6 = vector.broadcast %cst_5 : f32 to vector<2x32xf32>
    %7 = arith.maximumf %5, %6 : vector<2x32xf32>
    %c0_6 = arith.constant 0 : index
    %c0_7 = arith.constant 0 : index
    %8 = vector.load %arg4[%c0_6, %c0_7] : memref<32x32xf32, #tpu.memory_space<vmem>>, vector<32x32xf32>
    %cst_8 = arith.constant dense<0.000000e+00> : vector<2x32xf32>
    %9 = tpu.matmul %7, %8, %cst_8 {dimension_numbers = #tpu.dot_dimension_numbers<[1], [0], [0], [1], [0, 0, 1, 1], [], []>} : vector<2x32xf32>, vector<32x32xf32>, vector<2x32xf32> -> vector<2x32xf32>
    %c0_9 = arith.constant 0 : index
    %c0_10 = arith.constant 0 : index
    %10 = vector.load %arg5[%c0_9, %c0_10] : memref<1x32xf32, #tpu.memory_space<vmem>>, vector<1x32xf32>
    %11 = vector.broadcast %10 : vector<1x32xf32> to vector<2x32xf32>
    %12 = arith.addf %9, %11 : vector<2x32xf32>
    %cst_11 = arith.constant 0.000000e+00 : f32
    %13 = vector.broadcast %cst_11 : f32 to vector<2x32xf32>
    %14 = arith.maximumf %12, %13 : vector<2x32xf32>
    %c0_12 = arith.constant 0 : index
    %c0_13 = arith.constant 0 : index
    %15 = vector.load %arg6[%c0_12, %c0_13] : memref<32x8xf32, #tpu.memory_space<vmem>>, vector<32x8xf32>
    %cst_14 = arith.constant dense<0.000000e+00> : vector<2x8xf32>
    %16 = tpu.matmul %14, %15, %cst_14 {dimension_numbers = #tpu.dot_dimension_numbers<[1], [0], [0], [1], [0, 0, 1, 1], [], []>} : vector<2x32xf32>, vector<32x8xf32>, vector<2x8xf32> -> vector<2x8xf32>
    %c0_15 = arith.constant 0 : index
    %c0_16 = arith.constant 0 : index
    %17 = vector.load %arg7[%c0_15, %c0_16] : memref<1x8xf32, #tpu.memory_space<vmem>>, vector<1x8xf32>
    %18 = vector.broadcast %17 : vector<1x8xf32> to vector<2x8xf32>
    %19 = arith.addf %16, %18 : vector<2x8xf32>
    %c0_17 = arith.constant 0 : index
    %c0_18 = arith.constant 0 : index
    %20 = vector.load %arg8[%c0_17, %c0_18] : memref<2x8xf32, #tpu.memory_space<vmem>>, vector<2x8xf32>
    tpu.vector_store %arg8[%c0_17, %c0_18], %19 {strides = array<i32>} : memref<2x8xf32, #tpu.memory_space<vmem>>, vector<2x8xf32>,
    return
  }
  func.func @transform_0(%arg0: i32) -> (i32, i32) {
    %c0_i32 = arith.constant 0 : i32
    %c0_i32_0 = arith.constant 0 : i32
    return %arg0, %c0_i32 : i32, i32
  }
  func.func @transform_1(%arg0: i32) -> (i32, i32) {
    %c0_i32 = arith.constant 0 : i32
    %c0_i32_0 = arith.constant 0 : i32
    %c0_i32_1 = arith.constant 0 : i32
    return %c0_i32, %c0_i32_0 : i32, i32
  }
  func.func @transform_2(%arg0: i32) -> (i32, i32) {
    %c0_i32 = arith.constant 0 : i32
    %c0_i32_0 = arith.constant 0 : i32
    %c0_i32_1 = arith.constant 0 : i32
    return %c0_i32, %c0_i32_0 : i32, i32
  }
  func.func @transform_3(%arg0: i32) -> (i32, i32) {
    %c0_i32 = arith.constant 0 : i32
    %c0_i32_0 = arith.constant 0 : i32
    %c0_i32_1 = arith.constant 0 : i32
    return %c0_i32, %c0_i32_0 : i32, i32
  }
  func.func @transform_4(%arg0: i32) -> (i32, i32) {
    %c0_i32 = arith.constant 0 : i32
    %c0_i32_0 = arith.constant 0 : i32
    %c0_i32_1 = arith.constant 0 : i32
    return %c0_i32, %c0_i32_0 : i32, i32
  }
  func.func @transform_5(%arg0: i32) -> (i32, i32) {
    %c0_i32 = arith.constant 0 : i32
    %c0_i32_0 = arith.constant 0 : i32
    %c0_i32_1 = arith.constant 0 : i32
    return %c0_i32, %c0_i32_0 : i32, i32
  }
  func.func @transform_6(%arg0: i32) -> (i32, i32) {
    %c0_i32 = arith.constant 0 : i32
    %c0_i32_0 = arith.constant 0 : i32
    %c0_i32_1 = arith.constant 0 : i32
    return %c0_i32, %c0_i32_0 : i32, i32
  }
  func.func @transform_7(%arg0: i32) -> (i32, i32) {
    %c0_i32 = arith.constant 0 : i32
    %c0_i32_0 = arith.constant 0 : i32
    return %arg0, %c0_i32 : i32, i32
  }
}

</mosaic_0001>

<bundles_post_ra>
// kernel: tpu_custom_call.1
= control target key start
LH: loop header
LB: loop body
LE: loop exit
PB: predicated region body
PF: predicated region fallthrough
CT: control target
= control target key end

     0   :  { %12 = vsyncpa [#allocation3], 0  ;;  %s504_s0 = inlined_call_operand.vmem [shape: f32[2,16], index: 0, kind: input, shape index: {}]   ;;  %s505_s1 = inlined_call_operand.hbm [shape: f32[16,32], index: 1, kind: input, shape index: {}]   ;;  %s506_s2 = inlined_call_operand.vmem [shape: f32[1,32], index: 2, kind: input, shape index: {}]   ;;  %s507_s3 = inlined_call_operand.vmem [shape: f32[32,32], index: 3, kind: input, shape index: {}]   ;;  %s508_s4 = inlined_call_operand.vmem [shape: f32[1,32], index: 4, kind: input, shape index: {}]   ;;  %s509_s5 = inlined_call_operand.vmem [shape: f32[32,8], index: 5, kind: input, shape index: {}]   ;;  %s510_s6 = inlined_call_operand.vmem [shape: f32[1,8], index: 6, kind: input, shape index: {}]   ;;  %s511_s7 = inlined_call_operand.hbm [shape: f32[2,8], index: 7, kind: output, shape index: {}]  }
   0x1   :  { %13 = vsyncpa [#allocation4], 0  ;;  %s411_s24 = smov [#allocation2]  }
   0x2   :  { %s21_s25 = sshll.u32 %s411_s24, 4  ;;  %s22_s25 = int_to_ptr.vmem [resolvable:$true] %s21_s25 }
   0x3   :  { %s375_s26 = scalar_lea.vmem %s22_s25, 256  ;;  %p380_p1 = scmp.lt.s32.totalorder %s22_s25, %s22_s25 }
   0x4   :  { %p376_p0 = scmp.ne.s32.totalorder %s22_s25, %s375_s26  ;;  %p381_p2 = scmp.lt.s32.totalorder %s375_s26, %s375_s26 }
   0x6   :  { %p382_p3 = por %p381_p2, %p380_p1 }
   0x8   :  { %p383_p4 = pnand %p382_p3, %p376_p0 }
   0xa   :  { %386 = shalt.err (!%p383_p4)
}
   0xb   :  { %s412_s27 = smov 128   ;;  %s413_s28 = smov 8  }
   0xc   :  { %27 = dma.hbm_to_vmem [thread:$0]  %s505_s1, 256, %s22_s25, [#allocation3], %s412_s27, %s412_s27, %s413_s28  }
   0xd   :  { %407 = dma.done.wait [#allocation3], 256  }
   0xe   :  { %408 = vsyncadd [#allocation3], 4294967040  ;;  %v414_v0 = vmov 0.0   ;;  %vm415_vm0 = vmmov 0   ;;  %v43_v1 = vld [vmem:[#allocation2 + $0x8] sm:$0xff]  ;;  %v42_v2 = vld [vmem:[#allocation2] sm:$0xff] }
   0xf   :  { %332 = vmatprep.subr.mxu0 %v414_v0  ;;  %336 = vmatprep.mubr.msk.f32.mxu0 %vm415_vm0, %v414_v0  ;;  %v41_v3 = vld [vmem:[%s504_s0] sm:$0x3]  ;;  %vm51_vm1 = vcmask 130048   ;;  %v129_v4 = vld [vmem:[%s507_s3 + $0x18] sm:$0xff]  ;;  %v128_v5 = vld [vmem:[%s507_s3 + $0x10] sm:$0xff]  ;;  %vm137_vm2 = vcmask 261120  }
  0x10   :  { %339 = vmatprep.subr.mxu1 %v414_v0  ;;  %347 = vmatprep.mubr.msk.f32.mxu1 %vm415_vm0, %v414_v0  ;;  %v127_v6 = vld [vmem:[%s507_s3 + $0x8] sm:$0xff]  ;;  %v126_v7 = vld [vmem:[%s507_s3] sm:$0xff]  ;;  %v215_v8 = vld [vmem:[%s509_s5 + $0x18] sm:$0xff]  ;;  %s416_s28 = smov [#allocation5]   ;;  %vm296_vm3 = vcmask 58368  }
  0x11   :  { %333 = vmatpush3.msra.mxu0 %v43_v1  ;;  %340 = vmatpush3.msra.mxu1 %v129_v4  ;;  %v313_v9 = vld [vmem:[%s506_s2] ss:$0 sm:$0xff]  ;;  %v214_v14 = vld [vmem:[%s509_s5 + $0x10] sm:$0xff]  ;;  %v213_v15 = vld [vmem:[%s509_s5 + $0x8] sm:$0xff]  ;;  %s304_s29 = sshll.u32 %s416_s28, 4  ;;  %s305_s29 = int_to_ptr.vmem [resolvable:$true] %s304_s29 }
  0x12   :  { %334 = vmatprep.subr.mxu0 %v414_v0  ;;  %341 = vmatprep.subr.mxu1 %v414_v0  ;;  %v212_v16 = vld [vmem:[%s509_s5] sm:$0xff]  ;;  %s387_s5 = scalar_lea.vmem %s305_s29, 32  ;;  %p392_p6 = scmp.lt.s32.totalorder %s305_s29, %s305_s29 }
  0x13   :  { %335 = vmatpush3.msra.mxu0 %v42_v2  ;;  %342 = vmatpush3.msra.mxu1 %v128_v5  ;;  %v315_v17 = vld [vmem:[%s508_s4] ss:$0 sm:$0xff]  ;;  %p388_p5 = scmp.ne.s32.totalorder %s305_s29, %s387_s5  ;;  %p393_p7 = scmp.lt.s32.totalorder %s387_s5, %s387_s5 }
  0x14   :  { %337 = vmatmul.mubr.msk.f32.vlgmr.msra.gmra.mxu0 %vm51_vm1, %v41_v3  ;;  %350 = vmatprep.subr.mxu0 %v414_v0  ;;  %v317_v22 = vld [vmem:[%s510_s6] ss:$0 sm:$0xff] }
  0x15   :  { %358 = vmatprep.mubr.msk.f32.mxu0 %vm415_vm0, %v414_v0  ;;  %343 = vmatprep.subr.mxu1 %v414_v0  ;;  %p394_p8 = por %p393_p7, %p392_p6 }
  0x16   :  { %344 = vmatpush3.msra.mxu1 %v127_v6  ;;  %351 = vmatpush3.msra.mxu0 %v215_v8 }
  0x17   :  { %345 = vmatprep.subr.mxu1 %v414_v0  ;;  %352 = vmatprep.subr.mxu0 %v414_v0  ;;  %p395_p9 = pnand %p394_p8, %p388_p5 }
  0x18   :  { %346 = vmatpush3.msra.mxu1 %v126_v7  ;;  %353 = vmatpush3.msra.mxu0 %v214_v14 }
  0x19   :  { %354 = vmatprep.subr.mxu0 %v414_v0 }
  0x1a   :  { %355 = vmatpush3.msra.mxu0 %v213_v15 }
  0x1b   :  { %356 = vmatprep.subr.mxu0 %v414_v0 }
  0x1c   :  { %357 = vmatpush3.msra.mxu0 %v212_v16 }
  0xd4   :  { %v121_v10 = vpop.f32.mrf.mxu0 }
  0xd5   :  { %v122_v11 = vadd.f32 %v313_v9, %v121_v10 }
  0xd6   :  { %v338_v12 = vpop.f32.mrf.mxu0 }
  0xd7   :  { %v125_v13 = vmax.f32 %v122_v11, 0.0 }
  0xd9   :  { %348 = vmatmul.mubr.msk.f32.vlgmr.msra.gmra.mxu1 %vm137_vm2, %v125_v13 }
 0x199   :  { %v207_v18 = vpop.f32.mrf.mxu1 }
 0x19a   :  { %v208_v19 = vadd.f32 %v315_v17, %v207_v18 }
 0x19b   :  { %v349_v20 = vpop.f32.mrf.mxu1 }
 0x19c   :  { %v211_v21 = vmax.f32 %v208_v19, 0.0 }
 0x19e   :  { %359 = vmatmul.mubr.msk.f32.vlgmr.msra.gmra.mxu0 %vm137_vm2, %v211_v21 }
 0x25e   :  { %v292_v23 = vpop.f32.mrf.mxu0 }
 0x25f   :  { %v293_v24 = vadd.f32 %v317_v22, %v292_v23 }
 0x260   :  { %v360_v25 = vpop.f32.mrf.mxu0 }
 0x261   :  { %297 = vst.msk [vmem:[#allocation5] sm:$0x3] %vm296_vm3, %v293_v24 }
 0x262   :  { %398 = shalt.err (!%p395_p9)
}
 0x263   :  { %307 = dma.vmem_to_hbm [thread:$0]  %s305_s29, 32, %s511_s7, [#allocation4]  }
 0x264   :  { %409 = dma.done.wait [#allocation4], 32  }
 0x265   :  { %410 = vsyncadd [#allocation4], 4294967264 }
 0x266   :  { %311 = vsyncpa [#allocation3], 1 }
 0x267   :  { %312 = vsyncpa [#allocation4], 1 }

</bundles_post_ra>
